<compile_context>
chip_gen: v7x
topology: tpu7x:2x2x1
jax: 0.10.0
libtpu: 0.0.40
codegen_flags: <defaults>
</compile_context>

<pallas_src>
import functools
import math

import jax
import jax.numpy as jnp
from jax.experimental import pallas as pl
from jax.experimental.pallas import tpu as pltpu

P_DROP = 0.1
MAX_SEQ_LEN = 224


def calculate_positional_encodings(d_model, max_seq_len=MAX_SEQ_LEN):
    """Same math as the PyTorch buffer; shape (max_seq_len, d_model)."""
    position = jnp.arange(max_seq_len, dtype=jnp.float32)[:, None]          # (L, 1)
    div_term = jnp.exp(
        jnp.arange(0, d_model, 2, dtype=jnp.float32) * -(math.log(10000.0) / d_model)
    )                                                                        # (d/2,)
    pe = jnp.zeros((max_seq_len, d_model), jnp.float32)
    pe = pe.at[:, 0::2].set(jnp.sin(position * div_term))
    pe = pe.at[:, 1::2].set(jnp.cos(position * div_term))
    return pe


def _as_i32_const(x):
    """Wrap a python int to its int32 two's-complement value."""
    x &= 0xFFFFFFFF
    return x - (1 << 32) if x >= (1 << 31) else x


_MIX1 = _as_i32_const(0x7FEB352D)
_MIX2 = _as_i32_const(0x846CA68B)
_GOLD = _as_i32_const(0x9E3779B9)


def _mix32(x):
    """lowbias32 integer mixer in int32 (logical shifts via mask)."""
    x = x ^ ((x >> 16) & 0xFFFF)        # == shift_right_logical(x, 16)
    x = x * _MIX1                       # wrapping int32 multiply
    x = x ^ ((x >> 15) & 0x1FFFF)
    x = x * _MIX2
    x = x ^ ((x >> 16) & 0xFFFF)
    return x


def _pe_add_dropout_kernel(seed_ref, x_ref, pe_ref, o_ref, *, apply_dropout, p_drop):
    # x_ref : (TB, DL) VMEM tile (TB batch rows, lane-dense flattened features)
    # pe_ref: (1,  DL) VMEM tile (same block index every step -> stays resident)
    y = x_ref[...] + pe_ref[...]

    if apply_dropout:
        tb, dl = x_ref.shape
        i = pl.program_id(0)
        # Global (batch_row, feature) index -> mask independent of the tiling.
        row = jax.lax.broadcasted_iota(jnp.int32, (tb, dl), 0) + i * tb
        col = jax.lax.broadcasted_iota(jnp.int32, (tb, dl), 1)
        idx = row * dl + col
        bits = _mix32(idx ^ (seed_ref[0] * _GOLD))
        # Top 24 bits (non-negative int32) vs. integer threshold: drop iff below.
        r = (bits >> 8) & 0xFFFFFF
        threshold = int(round(p_drop * float(1 << 24)))
        keep = r >= threshold
        y = jnp.where(keep, y * (1.0 / (1.0 - p_drop)), 0.0)

    o_ref[...] = y


def _position_encoding_pallas(x, pe_table, *, seed, apply_dropout,
                              p_drop=P_DROP, donate_x=False):
    """x: (B, d_model, seq_len).  pe_table: (max_seq_len, d_model)."""
    B, D, L = x.shape
    DL = D * L

    # Lane-dense layout: one contiguous slab per batch row.
    x2 = x.reshape(B, DL)
    # (seq_len, d_model) -> (d_model, seq_len) -> (1, d_model*seq_len), pre-cast.
    pe2 = jnp.transpose(pe_table[:L, :], (1, 0)).reshape(1, DL).astype(x.dtype)

    # Batch-blocked tiles, ~1 MiB per input block (keep sublane dim 8-aligned
    # unless the block covers the full batch).
    itemsize = x2.dtype.itemsize
    row_bytes = DL * itemsize
    tb = min(B, max(1, (1 << 20) // max(row_bytes, 1)))
    if tb < B and tb % 8 != 0:
        tb = min(B, max(8, (tb // 8) * 8))
    grid = (pl.cdiv(B, tb),)

    # Double-buffered input + output tiles + resident pe + headroom; cap well
    # under v7x's 64 MiB physical VMEM (fits v5e/v6e defaults trivially).
    block_bytes = tb * row_bytes
    vmem_limit = int(min(max(4 * block_bytes + DL * itemsize + (2 << 20),
                             16 << 20),
                         48 << 20))

    kernel = functools.partial(_pe_add_dropout_kernel,
                               apply_dropout=apply_dropout, p_drop=p_drop)

    out2 = pl.pallas_call(
        kernel,
        out_shape=jax.ShapeDtypeStruct((B, DL), x.dtype),
        grid_spec=pltpu.PrefetchScalarGridSpec(
            num_scalar_prefetch=1,                       # seed -> SMEM
            grid=grid,
            in_specs=[
                pl.BlockSpec((tb, DL), lambda i, seed_ref: (i, 0)),
                pl.BlockSpec((1, DL), lambda i, seed_ref: (0, 0)),
            ],
            out_specs=pl.BlockSpec((tb, DL), lambda i, seed_ref: (i, 0)),
        ),
        compiler_params=pltpu.CompilerParams(
            dimension_semantics=("parallel",),           # independent per step
            vmem_limit_bytes=vmem_limit,
        ),
        # x is flattened input #1 (the prefetched seed is #0); alias it to the
        # output when the caller no longer needs x.
        input_output_aliases=({1: 0} if donate_x else {}),
    )(jnp.full((1,), seed, dtype=jnp.int32), x2, pe2)

    return out2.reshape(B, D, L)


def position_encoding_forward(x, pe_table, *, seed=0, train=True, donate_x=False):
    """PositionEncoding forward: x + PE (broadcast over batch), then dropout
    (p=0.1) when training.  x: (B, d_model, seq_len)."""
    if not train:
        # Pure broadcast add: leave to XLA so it fuses with neighbouring ops.
        _, _, L = x.shape
        pe = jnp.transpose(pe_table[:L, :], (1, 0)).astype(x.dtype)
        return x + pe[None]
    return _position_encoding_pallas(x, pe_table, seed=seed, apply_dropout=True,
                                     donate_x=donate_x)


if __name__ == "__main__":
    key = jax.random.PRNGKey(0)
    B, d_model, seq_len = 2, 32, 16
    x = jax.random.normal(key, (B, d_model, seq_len), dtype=jnp.float32)
    pe_table = calculate_positional_encodings(d_model, MAX_SEQ_LEN)

    ref = x + jnp.transpose(pe_table[:seq_len, :], (1, 0))[None]

    # 1) Pallas kernel, dropout disabled: must match the pure-JAX reference.
    y_add = _position_encoding_pallas(x, pe_table, seed=0, apply_dropout=False)
    y_add = jax.block_until_ready(y_add)
    assert y_add.shape == x.shape and y_add.dtype == x.dtype
    assert jnp.allclose(y_add, ref, atol=1e-5, rtol=1e-5)

    # 2) Eval-mode forward (plain XLA broadcast add, per perf feedback).
    y_eval = jax.block_until_ready(position_encoding_forward(x, pe_table, train=False))
    assert jnp.allclose(y_eval, ref, atol=1e-5, rtol=1e-5)

    # 3) Training-mode forward: inverted dropout p=0.1 via in-kernel hash PRNG.
    #    Kept elements must equal ref / (1 - p); a reasonable fraction dropped.
    y_train = jax.block_until_ready(
        position_encoding_forward(x, pe_table, seed=123, train=True))
    assert y_train.shape == x.shape and y_train.dtype == x.dtype
    kept = y_train != 0.0
    scale = 1.0 / (1.0 - P_DROP)
    assert jnp.allclose(jnp.where(kept, y_train, 0.0),
                        jnp.where(kept, ref * scale, 0.0),
                        atol=1e-5, rtol=1e-5)
    drop_frac = float(1.0 - jnp.mean(kept.astype(jnp.float32)))
    assert 0.0 < drop_frac < 0.4

    print("KERNEL_OK")
</pallas_src>

<mosaic_0001>
module attributes {stable_mosaic.version = 11 : i64} {
  func.func @_pe_add_dropout_kernel(%arg0: i32, %arg1: memref<1xi32, #tpu.memory_space<smem>>, %arg2: memref<2x512xf32, #tpu.memory_space<vmem>>, %arg3: memref<1x512xf32, #tpu.memory_space<vmem>>, %arg4: memref<2x512xf32, #tpu.memory_space<vmem>>) attributes {dimension_semantics = [#tpu.dimension_semantics<parallel>], iteration_bounds = array<i64: 1>, scalar_prefetch = 1 : i64, scratch_operands = 0 : i64, tpu.core_type = #tpu.core_type<tc>, window_params = [{transform_indices = @transform_0, window_bounds = array<i64: 2, 512>}, {pipeline_mode = #tpu.pipeline_mode<synchronous>, transform_indices = @transform_1, window_bounds = array<i64: 1, 512>}, {transform_indices = @transform_2, window_bounds = array<i64: 2, 512>}]} {
    %c0 = arith.constant 0 : index
    %c0_0 = arith.constant 0 : index
    %0 = vector.load %arg2[%c0, %c0_0] : memref<2x512xf32, #tpu.memory_space<vmem>>, vector<2x512xf32>
    %c0_1 = arith.constant 0 : index
    %c0_2 = arith.constant 0 : index
    %1 = vector.load %arg3[%c0_1, %c0_2] : memref<1x512xf32, #tpu.memory_space<vmem>>, vector<1x512xf32>
    %2 = vector.broadcast %1 : vector<1x512xf32> to vector<2x512xf32>
    %3 = arith.addf %0, %2 : vector<2x512xf32>
    %c0_3 = arith.constant 0 : index
    %c0_4 = arith.constant 0 : index
    %4 = vector.load %arg4[%c0_3, %c0_4] : memref<2x512xf32, #tpu.memory_space<vmem>>, vector<2x512xf32>
    tpu.vector_store %arg4[%c0_3, %c0_4], %3 {strides = array<i32>} : memref<2x512xf32, #tpu.memory_space<vmem>>, vector<2x512xf32>,
    return
  }
  func.func @transform_0(%arg0: i32, %arg1: memref<1xi32, #tpu.memory_space<smem>>) -> (i32, i32) {
    %c0_i32 = arith.constant 0 : i32
    %c0_i32_0 = arith.constant 0 : i32
    return %arg0, %c0_i32 : i32, i32
  }
  func.func @transform_1(%arg0: i32, %arg1: memref<1xi32, #tpu.memory_space<smem>>) -> (i32, i32) {
    %c0_i32 = arith.constant 0 : i32
    %c0_i32_0 = arith.constant 0 : i32
    %c0_i32_1 = arith.constant 0 : i32
    return %c0_i32, %c0_i32_0 : i32, i32
  }
  func.func @transform_2(%arg0: i32, %arg1: memref<1xi32, #tpu.memory_space<smem>>) -> (i32, i32) {
    %c0_i32 = arith.constant 0 : i32
    %c0_i32_0 = arith.constant 0 : i32
    return %arg0, %c0_i32 : i32, i32
  }
}

</mosaic_0001>

<bundles_post_ra>
// kernel: tpu_custom_call.1
= control target key start
LH: loop header
LB: loop body
LE: loop exit
PB: predicated region body
PF: predicated region fallthrough
CT: control target
= control target key end

     0   :  { %9 = vsyncpa [#allocation5], 0  ;;  %s181_s0 = inlined_call_operand.<no memory space> [shape: s32[1], index: 0, kind: input, shape index: {}]   ;;  %s182_s1 = inlined_call_operand.hbm [shape: f32[2,512], index: 1, kind: input, shape index: {}]   ;;  %s183_s2 = inlined_call_operand.vmem [shape: f32[1,512], index: 2, kind: input, shape index: {}]   ;;  %s184_s3 = inlined_call_operand.hbm [shape: f32[2,512], index: 3, kind: output, shape index: {}]  }
   0x1   :  { %10 = vsyncpa [#allocation6], 0  ;;  %s131_s12 = smov [#allocation4]   ;;  %s83_s16 = scalar_lea.hbm %s182_s1, 128 }
   0x2   :  { %s17_s13 = sshll.u32 %s131_s12, 4  ;;  %p84_p0 = scmp.ne.s32.totalorder %s182_s1, %s83_s16  ;;  %s18_s13 = int_to_ptr.vmem [resolvable:$true] %s17_s13 }
   0x3   :  { %p87_p1 = scmp.lt.u32.totalorder %s83_s16, %s182_s1 }
   0x5   :  { %p89_p2 = pnand %p87_p1, %p84_p0 }
   0x7   :  { %92 = shalt.err (!%p89_p2)
}
   0x8   :  { %s93_s20 = scalar_lea.vmem %s18_s13, 128  ;;  %p98_p4 = scmp.lt.s32.totalorder %s18_s13, %s18_s13 }
   0x9   :  { %p94_p3 = scmp.ne.s32.totalorder %s18_s13, %s93_s20  ;;  %p99_p5 = scmp.lt.s32.totalorder %s93_s20, %s93_s20 }
   0xb   :  { %p100_p6 = por %p99_p5, %p98_p4 }
   0xd   :  { %p101_p7 = pnand %p100_p6, %p94_p3 }
   0xf   :  { %104 = shalt.err (!%p101_p7)
}
  0x10   :  { %20 = dma.hbm_to_vmem [thread:$0]  %s182_s1, 128, %s18_s13, [#allocation5]  }
  0x11   :  { %127 = dma.done.wait [#allocation5], 128  }
  0x12   :  { %128 = vsyncadd [#allocation5], 4294967168  ;;  %v29_v0 = vlaneseq  ;;  %v132_v1 = vmov 1983009808   ;;  %v27_v9 = vld [vmem:[%s183_s2] sm:$0xf] }
  0x13   :  { %v48_v2 = vunpack.c.l.s4 %v132_v1  ;;  %v26_v19 = vld [vmem:[#allocation4] sm:$0xff]  ;;  %s133_s1 = smov [#allocation7]  }
  0x14   :  { %v30_v3 = vshrl.u32 %v29_v0, 7  ;;  %s71_s25 = sshll.u32 %s133_s1, 4  ;;  %s72_s25 = int_to_ptr.vmem [resolvable:$true] %s71_s25 }
  0x15   :  { %v49_v4 = vunpack.c.0.s8 %v48_v2  ;;  %s105_s26 = scalar_lea.vmem %s72_s25, 128  ;;  %p110_p9 = scmp.lt.s32.totalorder %s72_s25, %s72_s25 }
  0x16   :  { %v31_v5 = vsub.s32 0, %v30_v3  ;;  %v35_v6 = vsub.s32 1, %v30_v3  ;;  %v39_v7 = vsub.s32 2, %v30_v3  ;;  %v43_v8 = vsub.s32 3, %v30_v3  ;;  %p106_p8 = scmp.ne.s32.totalorder %s72_s25, %s105_s26  ;;  %p111_p10 = scmp.lt.s32.totalorder %s105_s26, %s105_s26 }
  0x17   :  { %v52_v10 = vsub.s32 %v49_v4, %v30_v3 }
  0x18   :  { %v32_v11 = vrot.slane %v27_v9, %v31_v5  ;;  %v36_v12 = vrot.slane %v27_v9, %v35_v6  ;;  %v40_v13 = vrot.slane %v27_v9, %v39_v7  ;;  %v44_v14 = vrot.slane %v27_v9, %v43_v8  ;;  %p112_p11 = por %p111_p10, %p110_p9 }
  0x1a   :  { %v45_v15 = vcombine.low %v32_v11, %v36_v12  ;;  %v46_v16 = vcombine.low %v40_v13, %v44_v14  ;;  %p113_p12 = pnand %p112_p11, %p106_p8 }
  0x1c   :  { %v53_v17 = vrot.slane %v45_v15, %v52_v10  ;;  %v60_v18 = vrot.slane %v46_v16, %v52_v10 }
  0x1e   :  { %v61_v20 = vcombine.low %v53_v17, %v60_v18 }
  0x20   :  { %v63_v21 = vadd.f32 %v61_v20, %v26_v19 }
  0x22   :  { %64 = vst [vmem:[#allocation7] sm:$0xff] %v63_v21 }
  0x23   :  { %116 = shalt.err (!%p113_p12)
}
  0x24   :  { %s117_s28 = scalar_lea.hbm %s184_s3, 128 }
  0x25   :  { %p118_p13 = scmp.ne.s32.totalorder %s184_s3, %s117_s28  ;;  %p121_p0 = scmp.lt.u32.totalorder %s117_s28, %s184_s3 }
  0x27   :  { %p123_p1 = pnand %p121_p0, %p118_p13 }
  0x29   :  { %126 = shalt.err (!%p123_p1)
}
  0x2a   :  { %74 = dma.vmem_to_hbm [thread:$0]  %s72_s25, 128, %s184_s3, [#allocation6]  }
  0x2b   :  { %129 = dma.done.wait [#allocation6], 128  }
  0x2c   :  { %130 = vsyncadd [#allocation6], 4294967168 }
  0x2d   :  { %78 = vsyncpa [#allocation5], 1 }
  0x2e   :  { %79 = vsyncpa [#allocation6], 1 }

</bundles_post_ra>
